<compile_context>
chip_gen: v7x
topology: tpu7x:2x2x1
jax: 0.10.0
libtpu: 0.0.40
codegen_flags: <defaults>
</compile_context>

<pallas_src>
import jax
import jax.numpy as jnp
from jax.experimental import pallas as pl
from jax.experimental.pallas import tpu as pltpu

NEG_SLOPE = 0.01  # PyTorch nn.LeakyReLU default negative_slope


def _leaky_relu(v):
    return jnp.where(v > 0, v, NEG_SLOPE * v)


def _round_up(n, m):
    return ((n + m - 1) // m) * m


def mapper_kernel(x_ref, w1_ref, b1_ref, w2_ref, b2_ref, o_ref):
    # Hot path: both matmuls + bias + LeakyReLU fused in one VMEM-resident kernel.
    x = x_ref[...]
    h = jnp.dot(x, w1_ref[...], preferred_element_type=jnp.float32) + b1_ref[...]
    h = _leaky_relu(h)
    y = jnp.dot(h, w2_ref[...], preferred_element_type=jnp.float32) + b2_ref[...]
    o_ref[...] = _leaky_relu(y).astype(o_ref.dtype)


def _auto_block_b(b_padded):
    # Large tiles amortize per-step overhead and fill the MXU along M.
    # Keep >=2 grid iterations for big batches so v7x's two TensorCores both get
    # work via the "parallel" grid axis; 512 rows is already ~85% of HBM roofline.
    if b_padded >= 1024:
        return 512
    if b_padded >= 64:
        return _round_up(pl.cdiv(b_padded, 2), 8)
    return b_padded


def mapper_forward(x, w1, b1, w2, b2, *, block_b=None):
    """x: (B, input_size); returns (B, token_length * output_n)."""
    B, in_dim = x.shape
    hidden = w1.shape[1]
    out_dim = w2.shape[1]
    dtype = x.dtype

    # --- Pad hidden to a lane-full multiple of 128 (zero pad -> identical result:
    #     padded h columns are leaky_relu(0)=0 and hit zero rows of w2).
    hidden_p = max(_round_up(hidden, 128), 128)
    if hidden_p != hidden:
        w1 = jnp.pad(w1, ((0, 0), (0, hidden_p - hidden)))
        b1 = jnp.pad(b1, ((0, 0), (0, hidden_p - hidden)))
        w2 = jnp.pad(w2, ((0, hidden_p - hidden), (0, 0)))

    # --- Pick a batch tile and zero-pad the batch so any B works.
    b_pad8 = _round_up(max(B, 1), 8)
    if block_b is None:
        block_b = _auto_block_b(b_pad8)
    block_b = max(8, _round_up(block_b, 8))
    b_padded = _round_up(b_pad8, block_b)
    if b_padded != B:
        x = jnp.pad(x, ((0, b_padded - B), (0, 0)))

    grid = (b_padded // block_b,)

    # Weights/biases use a constant index_map -> keep a single VMEM buffer each.
    resident = pl.Buffered(1)

    out = pl.pallas_call(
        mapper_kernel,
        out_shape=jax.ShapeDtypeStruct((b_padded, out_dim), dtype),
        grid_spec=pltpu.PrefetchScalarGridSpec(
            num_scalar_prefetch=0,
            grid=grid,
            in_specs=[
                pl.BlockSpec((block_b, in_dim), lambda i: (i, 0)),        # x tile
                pl.BlockSpec((in_dim, hidden_p), lambda i: (0, 0),
                             pipeline_mode=resident),                      # w1 (whole)
                pl.BlockSpec((1, hidden_p), lambda i: (0, 0),
                             pipeline_mode=resident),                      # b1
                pl.BlockSpec((hidden_p, out_dim), lambda i: (0, 0),
                             pipeline_mode=resident),                      # w2 (whole)
                pl.BlockSpec((1, out_dim), lambda i: (0, 0),
                             pipeline_mode=resident),                      # b2
            ],
            out_specs=pl.BlockSpec((block_b, out_dim), lambda i: (i, 0)),
        ),
        compiler_params=pltpu.CompilerParams(
            dimension_semantics=("parallel",)
        ),
    )(x, w1, b1, w2, b2)

    return out[:B]


def init_mapper_params(key, input_size, token_length, output_n, dtype=jnp.float32):
    """Deterministic synthetic params matching nn.Linear shapes (stored transposed)."""
    hidden = token_length * output_n // 2
    out_dim = token_length * output_n
    k1, k2, k3, k4 = jax.random.split(key, 4)
    lim1 = 1.0 / (input_size ** 0.5)
    lim2 = 1.0 / (hidden ** 0.5)
    w1 = jax.random.uniform(k1, (input_size, hidden), dtype, -lim1, lim1)
    b1 = jax.random.uniform(k2, (1, hidden), dtype, -lim1, lim1)
    w2 = jax.random.uniform(k3, (hidden, out_dim), dtype, -lim2, lim2)
    b2 = jax.random.uniform(k4, (1, out_dim), dtype, -lim2, lim2)
    return w1, b1, w2, b2


def mapper_reference(x, w1, b1, w2, b2):
    h = _leaky_relu(x @ w1 + b1)
    return _leaky_relu(h @ w2 + b2)


if __name__ == "__main__":
    # Shapes consistent with the module: input_size=32, token_length=8, output_n=16
    # -> hidden = 64, out = 128.
    input_size, token_length, output_n = 32, 8, 16
    out_dim = token_length * output_n

    key = jax.random.PRNGKey(0)
    kx, kp, kx2 = jax.random.split(key, 3)
    w1, b1, w2, b2 = init_mapper_params(kp, input_size, token_length, output_n)

    # Test 1: small batch (single grid step, auto tile).
    B1 = 8
    x1 = jax.random.normal(kx, (B1, input_size), jnp.float32)
    out1 = jax.block_until_ready(mapper_forward(x1, w1, b1, w2, b2))
    ref1 = mapper_reference(x1, w1, b1, w2, b2)
    assert out1.shape == (B1, out_dim)
    assert jnp.allclose(out1, ref1, atol=2e-5, rtol=2e-5)

    # Test 2: batch not divisible by the tile -> exercises padding + 2-step grid.
    B2 = 200
    x2 = jax.random.normal(kx2, (B2, input_size), jnp.float32)
    out2 = jax.block_until_ready(mapper_forward(x2, w1, b1, w2, b2))
    ref2 = mapper_reference(x2, w1, b1, w2, b2)
    assert out2.shape == (B2, out_dim)
    assert jnp.allclose(out2, ref2, atol=2e-5, rtol=2e-5)

    print("KERNEL_OK")
</pallas_src>

<mosaic_0001>
module attributes {stable_mosaic.version = 11 : i64} {
  func.func @mapper_kernel(%arg0: i32, %arg1: memref<8x32xf32, #tpu.memory_space<vmem>>, %arg2: memref<32x128xf32, #tpu.memory_space<vmem>>, %arg3: memref<1x128xf32, #tpu.memory_space<vmem>>, %arg4: memref<128x128xf32, #tpu.memory_space<vmem>>, %arg5: memref<1x128xf32, #tpu.memory_space<vmem>>, %arg6: memref<8x128xf32, #tpu.memory_space<vmem>>) attributes {dimension_semantics = [#tpu.dimension_semantics<parallel>], iteration_bounds = array<i64: 1>, scalar_prefetch = 0 : i64, scratch_operands = 0 : i64, tpu.core_type = #tpu.core_type<tc>, window_params = [{transform_indices = @transform_0, window_bounds = array<i64: 8, 32>}, {pipeline_mode = #tpu.pipeline_mode<synchronous>, transform_indices = @transform_1, window_bounds = array<i64: 32, 128>}, {pipeline_mode = #tpu.pipeline_mode<synchronous>, transform_indices = @transform_2, window_bounds = array<i64: 1, 128>}, {pipeline_mode = #tpu.pipeline_mode<synchronous>, transform_indices = @transform_3, window_bounds = array<i64: 128, 128>}, {pipeline_mode = #tpu.pipeline_mode<synchronous>, transform_indices = @transform_4, window_bounds = array<i64: 1, 128>}, {transform_indices = @transform_5, window_bounds = array<i64: 8, 128>}]} {
    %c0 = arith.constant 0 : index
    %c0_0 = arith.constant 0 : index
    %0 = vector.load %arg1[%c0, %c0_0] : memref<8x32xf32, #tpu.memory_space<vmem>>, vector<8x32xf32>
    %c0_1 = arith.constant 0 : index
    %c0_2 = arith.constant 0 : index
    %1 = vector.load %arg2[%c0_1, %c0_2] : memref<32x128xf32, #tpu.memory_space<vmem>>, vector<32x128xf32>
    %cst = arith.constant dense<0.000000e+00> : vector<8x128xf32>
    %2 = tpu.matmul %0, %1, %cst {dimension_numbers = #tpu.dot_dimension_numbers<[1], [0], [0], [1], [0, 0, 1, 1], [], []>} : vector<8x32xf32>, vector<32x128xf32>, vector<8x128xf32> -> vector<8x128xf32>
    %c0_3 = arith.constant 0 : index
    %c0_4 = arith.constant 0 : index
    %3 = vector.load %arg3[%c0_3, %c0_4] : memref<1x128xf32, #tpu.memory_space<vmem>>, vector<1x128xf32>
    %4 = vector.broadcast %3 : vector<1x128xf32> to vector<8x128xf32>
    %5 = arith.addf %2, %4 : vector<8x128xf32>
    %cst_5 = arith.constant 0.000000e+00 : f32
    %6 = vector.broadcast %cst_5 : f32 to vector<8x128xf32>
    %7 = arith.cmpf ogt, %5, %6 : vector<8x128xf32>
    %cst_6 = arith.constant 0.00999999977 : f32
    %8 = vector.broadcast %cst_6 : f32 to vector<8x128xf32>
    %9 = arith.mulf %8, %5 : vector<8x128xf32>
    %10 = arith.select %7, %5, %9 : vector<8x128xi1>, vector<8x128xf32>
    %c0_7 = arith.constant 0 : index
    %c0_8 = arith.constant 0 : index
    %11 = vector.load %arg4[%c0_7, %c0_8] : memref<128x128xf32, #tpu.memory_space<vmem>>, vector<128x128xf32>
    %cst_9 = arith.constant dense<0.000000e+00> : vector<8x128xf32>
    %12 = tpu.matmul %10, %11, %cst_9 {dimension_numbers = #tpu.dot_dimension_numbers<[1], [0], [0], [1], [0, 0, 1, 1], [], []>} : vector<8x128xf32>, vector<128x128xf32>, vector<8x128xf32> -> vector<8x128xf32>
    %c0_10 = arith.constant 0 : index
    %c0_11 = arith.constant 0 : index
    %13 = vector.load %arg5[%c0_10, %c0_11] : memref<1x128xf32, #tpu.memory_space<vmem>>, vector<1x128xf32>
    %14 = vector.broadcast %13 : vector<1x128xf32> to vector<8x128xf32>
    %15 = arith.addf %12, %14 : vector<8x128xf32>
    %cst_12 = arith.constant 0.000000e+00 : f32
    %16 = vector.broadcast %cst_12 : f32 to vector<8x128xf32>
    %17 = arith.cmpf ogt, %15, %16 : vector<8x128xf32>
    %cst_13 = arith.constant 0.00999999977 : f32
    %18 = vector.broadcast %cst_13 : f32 to vector<8x128xf32>
    %19 = arith.mulf %18, %15 : vector<8x128xf32>
    %20 = arith.select %17, %15, %19 : vector<8x128xi1>, vector<8x128xf32>
    %c0_14 = arith.constant 0 : index
    %c0_15 = arith.constant 0 : index
    %21 = vector.load %arg6[%c0_14, %c0_15] : memref<8x128xf32, #tpu.memory_space<vmem>>, vector<8x128xf32>
    tpu.vector_store %arg6[%c0_14, %c0_15], %20 {strides = array<i32>} : memref<8x128xf32, #tpu.memory_space<vmem>>, vector<8x128xf32>,
    return
  }
  func.func @transform_0(%arg0: i32) -> (i32, i32) {
    %c0_i32 = arith.constant 0 : i32
    %c0_i32_0 = arith.constant 0 : i32
    return %arg0, %c0_i32 : i32, i32
  }
  func.func @transform_1(%arg0: i32) -> (i32, i32) {
    %c0_i32 = arith.constant 0 : i32
    %c0_i32_0 = arith.constant 0 : i32
    %c0_i32_1 = arith.constant 0 : i32
    return %c0_i32, %c0_i32_0 : i32, i32
  }
  func.func @transform_2(%arg0: i32) -> (i32, i32) {
    %c0_i32 = arith.constant 0 : i32
    %c0_i32_0 = arith.constant 0 : i32
    %c0_i32_1 = arith.constant 0 : i32
    return %c0_i32, %c0_i32_0 : i32, i32
  }
  func.func @transform_3(%arg0: i32) -> (i32, i32) {
    %c0_i32 = arith.constant 0 : i32
    %c0_i32_0 = arith.constant 0 : i32
    %c0_i32_1 = arith.constant 0 : i32
    return %c0_i32, %c0_i32_0 : i32, i32
  }
  func.func @transform_4(%arg0: i32) -> (i32, i32) {
    %c0_i32 = arith.constant 0 : i32
    %c0_i32_0 = arith.constant 0 : i32
    %c0_i32_1 = arith.constant 0 : i32
    return %c0_i32, %c0_i32_0 : i32, i32
  }
  func.func @transform_5(%arg0: i32) -> (i32, i32) {
    %c0_i32 = arith.constant 0 : i32
    %c0_i32_0 = arith.constant 0 : i32
    return %arg0, %c0_i32 : i32, i32
  }
}

</mosaic_0001>

<bundles_post_ra>
// kernel: tpu_custom_call.1
= control target key start
LH: loop header
LB: loop body
LE: loop exit
PB: predicated region body
PF: predicated region fallthrough
CT: control target
= control target key end

     0   :  { %10 = vsyncpa [#allocation3], 0  ;;  %s565_s0 = inlined_call_operand.hbm [shape: f32[8,32], index: 0, kind: input, shape index: {}]   ;;  %s566_s1 = inlined_call_operand.hbm [shape: f32[32,128], index: 1, kind: input, shape index: {}]   ;;  %s567_s2 = inlined_call_operand.vmem [shape: f32[1,128], index: 2, kind: input, shape index: {}]   ;;  %s568_s3 = inlined_call_operand.hbm [shape: f32[128,128], index: 3, kind: input, shape index: {}]   ;;  %s569_s4 = inlined_call_operand.vmem [shape: f32[1,128], index: 4, kind: input, shape index: {}]   ;;  %s570_s5 = inlined_call_operand.hbm [shape: f32[8,128], index: 5, kind: output, shape index: {}]  }
   0x1   :  { %11 = vsyncpa [#allocation6], 0 }
   0x2   :  { %12 = vsyncpa [#allocation4], 0  ;;  %s466_s18 = smov [#allocation5]   ;;  %s372_s22 = scalar_lea.hbm %s566_s1, 512 }
   0x3   :  { %s28_s19 = sshll.u32 %s466_s18, 4  ;;  %p373_p0 = scmp.ne.s32.totalorder %s566_s1, %s372_s22  ;;  %s29_s19 = int_to_ptr.vmem [resolvable:$true] %s28_s19 }
   0x4   :  { %p376_p1 = scmp.lt.u32.totalorder %s372_s22, %s566_s1 }
   0x6   :  { %p378_p2 = pnand %p376_p1, %p373_p0 }
   0x8   :  { %381 = shalt.err (!%p378_p2)
}
   0x9   :  { %s382_s27 = scalar_lea.vmem %s29_s19, 512  ;;  %p387_p4 = scmp.lt.s32.totalorder %s29_s19, %s29_s19 }
   0xa   :  { %p383_p3 = scmp.ne.s32.totalorder %s29_s19, %s382_s27  ;;  %p388_p5 = scmp.lt.s32.totalorder %s382_s27, %s382_s27 }
   0xc   :  { %p389_p6 = por %p388_p5, %p387_p4 }
   0xe   :  { %p390_p7 = pnand %p389_p6, %p383_p3 }
  0x10   :  { %393 = shalt.err (!%p390_p7)
}
  0x11   :  { %s467_s28 = smov 128   ;;  %s468_s29 = smov 8  }
  0x12   :  { %34 = dma.hbm_to_vmem [thread:$0]  %s566_s1, 512, %s29_s19, [#allocation6], %s467_s28, %s467_s28, %s468_s29  }
  0x13   :  { %s469_s7 = smov [#allocation2]   ;;  %s470_s9 = smov [#allocation7]  }
  0x14   :  { %s19_s8 = sshll.u32 %s469_s7, 4  ;;  %s42_s10 = sshll.u32 %s470_s9, 4  ;;  %s20_s8 = int_to_ptr.vmem [resolvable:$true] %s19_s8  ;;  %s43_s10 = int_to_ptr.vmem [resolvable:$true] %s42_s10 }
  0x15   :  { %s394_s13 = scalar_lea.hbm %s565_s0, 128 }
  0x16   :  { %p395_p8 = scmp.ne.s32.totalorder %s565_s0, %s394_s13  ;;  %p398_p9 = scmp.lt.u32.totalorder %s394_s13, %s565_s0 }
  0x18   :  { %p400_p10 = pnand %p398_p9, %p395_p8 }
  0x1a   :  { %403 = shalt.err (!%p400_p10)
}
  0x1b   :  { %s404_s1 = scalar_lea.vmem %s20_s8, 128  ;;  %p409_p12 = scmp.lt.s32.totalorder %s20_s8, %s20_s8 }
  0x1c   :  { %p405_p11 = scmp.ne.s32.totalorder %s20_s8, %s404_s1  ;;  %p410_p13 = scmp.lt.s32.totalorder %s404_s1, %s404_s1 }
  0x1e   :  { %p411_p0 = por %p410_p13, %p409_p12 }
  0x20   :  { %p412_p1 = pnand %p411_p0, %p405_p11 }
  0x22   :  { %415 = shalt.err (!%p412_p1)
}
  0x23   :  { %22 = dma.hbm_to_vmem [thread:$0]  %s565_s0, 128, %s20_s8, [#allocation3]  }
  0x24   :  { %s416_s22 = scalar_lea.hbm %s568_s3, 2048 }
  0x25   :  { %p417_p2 = scmp.ne.s32.totalorder %s568_s3, %s416_s22  ;;  %p420_p3 = scmp.lt.u32.totalorder %s416_s22, %s568_s3 }
  0x27   :  { %p422_p4 = pnand %p420_p3, %p417_p2 }
  0x29   :  { %425 = shalt.err (!%p422_p4)
}
  0x2a   :  { %s426_s27 = scalar_lea.vmem %s43_s10, 2048  ;;  %p431_p6 = scmp.lt.s32.totalorder %s43_s10, %s43_s10 }
  0x2b   :  { %p427_p5 = scmp.ne.s32.totalorder %s43_s10, %s426_s27  ;;  %p432_p7 = scmp.lt.s32.totalorder %s426_s27, %s426_s27 }
  0x2d   :  { %p433_p8 = por %p432_p7, %p431_p6 }
  0x2f   :  { %p434_p9 = pnand %p433_p8, %p427_p5 }
  0x31   :  { %437 = shalt.err (!%p434_p9)
}
  0x32   :  { %48 = dma.hbm_to_vmem [thread:$0]  %s568_s3, 2048, %s43_s10, [#allocation6], %s467_s28, %s467_s28, %s468_s29  }
  0x33   :  { %460 = dma.done.wait [#allocation3], 128  }
  0x34   :  { %461 = vsyncadd [#allocation3], 4294967168 }
  0x35   :  { %462 = dma.done.wait [#allocation6], 2560  }
  0x36   :  { %463 = vsyncadd [#allocation6], 4294964736  ;;  %v471_v0 = vmov 0.0|0.0   ;;  %vm472_vm0 = vmmov 0   ;;  %v473_v1 = vmov 0.0   ;;  %v61_v2 = vld [vmem:[#allocation5] sm:$0xff] }
  0x37   :  { %333 = vmatprep.subr.bf16.mxu0 %v471_v0  ;;  %295 = vmatprep.mubr.msk.f32.mxu0 %vm472_vm0, %v473_v1  ;;  %v62_v3 = vld [vmem:[#allocation5 + $0x8] sm:$0xff]  ;;  %v63_v4 = vld [vmem:[#allocation5 + $0x10] sm:$0xff]  ;;  %v64_v6 = vld [vmem:[#allocation5 + $0x18] sm:$0xff]  ;;  %vm72_vm1 = vcmask 261120   ;;  %s474_s7 = smov [#allocation8]  }
  0x38   :  { %339 = vmatprep.subr.bf16.mxu1 %v471_v0  ;;  %330 = vmatprep.mubr.msk.f32.mxu1 %vm472_vm0, %v473_v1  ;;  %v334_v5 = vpack.c.bf16 %v62_v3, %v61_v2  ;;  %v149_v7 = vld [vmem:[#allocation7] sm:$0xff]  ;;  %v150_v8 = vld [vmem:[#allocation7 + $0x8] sm:$0xff]  ;;  %v151_v9 = vld [vmem:[#allocation7 + $0x10] sm:$0xff]  ;;  %v337_v11 = vpack.c.bf16 %v64_v6, %v63_v4  ;;  %s252_s8 = sshll.u32 %s474_s7, 4  ;;  %s253_s8 = int_to_ptr.vmem [resolvable:$true] %s252_s8 }
  0x39   :  { %v152_v10 = vld [vmem:[#allocation7 + $0x18] sm:$0xff]  ;;  %v340_v12 = vpack.c.bf16 %v150_v8, %v149_v7  ;;  %v153_v14 = vld [vmem:[#allocation7 + $0x20] sm:$0xff]  ;;  %v154_v15 = vld [vmem:[#allocation7 + $0x28] sm:$0xff]  ;;  %p443_p11 = scmp.lt.s32.totalorder %s253_s8, %s253_s8 }
  0x3a   :  { %335 = vmatpush3.bf16.msra.mxu0 %v334_v5  ;;  %v343_v13 = vpack.c.bf16 %v152_v10, %v151_v9  ;;  %v60_v16 = vld [vmem:[#allocation2] sm:$0xff]  ;;  %v346_v17 = vpack.c.bf16 %v154_v15, %v153_v14  ;;  %v155_v18 = vld [vmem:[#allocation7 + $0x30] sm:$0xff]  ;;  %v157_v21 = vld [vmem:[#allocation7 + $0x40] sm:$0xff] }
  0x3b   :  { %336 = vmatprep.subr.bf16.mxu0 %v471_v0  ;;  %341 = vmatpush3.bf16.msra.mxu1 %v340_v12  ;;  %v156_v19 = vld [vmem:[#allocation7 + $0x38] sm:$0xff]  ;;  %v158_v22 = vld [vmem:[#allocation7 + $0x48] sm:$0xff]  ;;  %v159_v24 = vld [vmem:[#allocation7 + $0x50] sm:$0xff] }
  0x3c   :  { %342 = vmatprep.subr.bf16.mxu1 %v471_v0  ;;  %v349_v20 = vpack.c.bf16 %v156_v19, %v155_v18  ;;  %v352_v23 = vpack.c.bf16 %v158_v22, %v157_v21  ;;  %v160_v25 = vld [vmem:[#allocation7 + $0x58] sm:$0xff]  ;;  %v161_v27 = vld [vmem:[#allocation7 + $0x60] sm:$0xff]  ;;  %v162_v28 = vld [vmem:[#allocation7 + $0x68] sm:$0xff] }
  0x3d   :  { %v355_v26 = vpack.c.bf16 %v160_v25, %v159_v24  ;;  %v358_v29 = vpack.c.bf16 %v162_v28, %v161_v27  ;;  %v163_v30 = vld [vmem:[#allocation7 + $0x70] sm:$0xff]  ;;  %v164_v31 = vld [vmem:[#allocation7 + $0x78] sm:$0xff] }
  0x3e   :  { %338 = vmatpush3.bf16.msra.mxu0 %v337_v11  ;;  %v361_v32 = vpack.c.bf16 %v164_v31, %v163_v30  ;;  %v262_v33 = vld [vmem:[%s567_s2] ss:$0 sm:$0xff]  ;;  %s438_s2 = scalar_lea.vmem %s253_s8, 128 }
  0x3f   :  { %344 = vmatpush3.bf16.msra.mxu1 %v343_v13  ;;  %v264_v39 = vld [vmem:[%s569_s4] ss:$0 sm:$0xff]  ;;  %p439_p10 = scmp.ne.s32.totalorder %s253_s8, %s438_s2  ;;  %p444_p12 = scmp.lt.s32.totalorder %s438_s2, %s438_s2 }
  0x40   :  { %345 = vmatprep.subr.bf16.mxu1 %v471_v0 }
  0x41   :  { %296 = vmatmul.mubr.msk.f32.vlgmr.msra.gmra.mrb[0].mxu0 %vm72_vm1, %v60_v16  ;;  %p445_p13 = por %p444_p12, %p443_p11 }
  0x43   :  { %347 = vmatpush3.bf16.msra.mxu1 %v346_v17  ;;  %p446_p0 = pnand %p445_p13, %p439_p10 }
  0x44   :  { %348 = vmatprep.subr.bf16.mxu1 %v471_v0 }
  0x47   :  { %350 = vmatpush3.bf16.msra.mxu1 %v349_v20 }
  0x48   :  { %351 = vmatprep.subr.bf16.mxu1 %v471_v0 }
  0x4b   :  { %353 = vmatpush3.bf16.msra.mxu1 %v352_v23 }
  0x4c   :  { %354 = vmatprep.subr.bf16.mxu1 %v471_v0 }
  0x4f   :  { %356 = vmatpush3.bf16.msra.mxu1 %v355_v26 }
  0x50   :  { %357 = vmatprep.subr.bf16.mxu1 %v471_v0 }
  0x53   :  { %359 = vmatpush3.bf16.msra.mxu1 %v358_v29 }
  0x54   :  { %360 = vmatprep.subr.bf16.mxu1 %v471_v0 }
  0x57   :  { %362 = vmatpush3.bf16.msra.mxu1 %v361_v32 }
 0x114   :  { %v142_v34 = vpop.f32.mrb[0].mxu0 }
 0x115   :  { %v143_v35 = vadd.f32 %v262_v33, %v142_v34  ;;  %v297_v36 = vpop.f32.mrb[1].mxu0 }
 0x117   :  { %v147_v37 = vmul.f32 0.01, %v143_v35  ;;  %vm146_vm2 = vcmp.gt.f32.partialorder %v143_v35, 0.0 }
 0x119   :  { %v148_v38 = vsel %vm146_vm2, %v143_v35, %v147_v37 }
 0x11a   :  { %331 = vmatmul.mubr.f32.vlgmr.msra.gmra.mrb[0].mxu1 %v148_v38 }
 0x1ed   :  { %v238_v40 = vpop.f32.mrb[0].mxu1 }
 0x1ee   :  { %v239_v41 = vadd.f32 %v264_v39, %v238_v40  ;;  %v332_v42 = vpop.f32.mrb[1].mxu1 }
 0x1f0   :  { %v243_v43 = vmul.f32 0.01, %v239_v41  ;;  %vm242_vm3 = vcmp.gt.f32.partialorder %v239_v41, 0.0 }
 0x1f2   :  { %v244_v44 = vsel %vm242_vm3, %v239_v41, %v243_v43 }
 0x1f3   :  { %245 = vst [vmem:[#allocation8] sm:$0xff] %v244_v44 }
 0x1f4   :  { %449 = shalt.err (!%p446_p0)
}
 0x1f5   :  { %s450_s4 = scalar_lea.hbm %s570_s5, 128 }
 0x1f6   :  { %p451_p1 = scmp.ne.s32.totalorder %s570_s5, %s450_s4  ;;  %p454_p2 = scmp.lt.u32.totalorder %s450_s4, %s570_s5 }
 0x1f8   :  { %p456_p3 = pnand %p454_p2, %p451_p1 }
 0x1fa   :  { %459 = shalt.err (!%p456_p3)
}
 0x1fb   :  { %255 = dma.vmem_to_hbm [thread:$0]  %s253_s8, 128, %s570_s5, [#allocation4]  }
 0x1fc   :  { %464 = dma.done.wait [#allocation4], 128  }
 0x1fd   :  { %465 = vsyncadd [#allocation4], 4294967168 }
 0x1fe   :  { %259 = vsyncpa [#allocation3], 1 }
 0x1ff   :  { %260 = vsyncpa [#allocation6], 1 }
 0x200   :  { %261 = vsyncpa [#allocation4], 1 }

</bundles_post_ra>
